<compile_context>
chip_gen: v7x
topology: tpu7x:2x2x1
jax: 0.10.0
libtpu: 0.0.40
codegen_flags: <defaults>
</compile_context>

<pallas_src>
import functools

import jax
import jax.numpy as jnp
from jax.experimental import pallas as pl
from jax.experimental.pallas import tpu as pltpu

LN_EPS = 1e-5  # torch.nn.LayerNorm default


def _patch_merge_kernel(x_ref, wev_ref, wod_ref, bw_ref, o_ref):
    # x_ref  : (tr, 2, W2, 2C)  parity 0 channels = [x0|x2], parity 1 = [x1|x3]
    # w*_ref : (2C, 2C)         gamma-folded reduction weight rows per parity half
    # bw_ref : (1, 2C)          beta @ W (f32), added after the matmul
    # o_ref  : (tr, W2, 2C)
    tr, _, w2, c2 = x_ref.shape
    rows = tr * w2

    ev = x_ref[:, 0].astype(jnp.float32)   # (tr, W2, 2C), static slice (free)
    od = x_ref[:, 1].astype(jnp.float32)

    # LayerNorm stats over the full 4C merged channels (split across ev|od),
    # one pass in f32 (biased variance, matches PyTorch).
    inv_n = 1.0 / (2 * c2)
    s1 = jnp.sum(ev, axis=-1, keepdims=True) + jnp.sum(od, axis=-1, keepdims=True)
    s2 = (jnp.sum(ev * ev, axis=-1, keepdims=True)
          + jnp.sum(od * od, axis=-1, keepdims=True))
    mean = s1 * inv_n
    var = jnp.maximum(s2 * inv_n - mean * mean, 0.0)   # clamp cancellation
    rstd = jax.lax.rsqrt(var + LN_EPS)

    w_ev = wev_ref[...]
    w_od = wod_ref[...]

    # Affine (gamma/beta) already folded into w_ev/w_od/bw in the wrapper.
    y_ev = ((ev - mean) * rstd).astype(w_ev.dtype).reshape(rows, c2)
    y_od = ((od - mean) * rstd).astype(w_od.dtype).reshape(rows, c2)

    # Linear(4C -> 2C, bias=False) as two half-K matmuls on the MXU (f32 acc).
    acc = jnp.dot(y_ev, w_ev, preferred_element_type=jnp.float32)
    acc = acc + jnp.dot(y_od, w_od, preferred_element_type=jnp.float32)
    acc = acc + bw_ref[...]

    o_ref[...] = acc.reshape(tr, w2, c2).astype(o_ref.dtype)


def _choose_tiling(bh2, w2, target_rows):
    """Pick (tr, steps, padded_bh2): big tiles, even step count >= 2 if possible."""
    cap = max(1, min(bh2, target_rows // max(w2, 1)))
    best_even = best_any = None
    for d in range(cap, 0, -1):
        if bh2 % d:
            continue
        steps = bh2 // d
        if steps >= 2:
            if best_any is None:
                best_any = d
            if steps % 2 == 0:
                best_even = d
                break
    best = best_even if best_even is not None else best_any
    if best is not None and 2 * best >= cap:
        return best, bh2 // best, bh2
    # Awkward divisors (e.g. prime bh2): pad to keep tiles large and steps even.
    steps = max(2, -(-bh2 // cap))
    if steps % 2:
        steps += 1
    tr = -(-bh2 // steps)
    return tr, steps, tr * steps


def patch_merging(x, gamma, beta, w_t, *, input_resolution, target_rows=2048,
                  mxu_dtype=jnp.bfloat16):
    """x: (B, H*W, C) -> (B, (H/2)*(W/2), 2*C).  w_t is (4C, 2C) = torch weight.T."""
    H, W = input_resolution
    B, L, C = x.shape
    assert L == H * W, "input feature has wrong size"
    assert H % 2 == 0 and W % 2 == 0, f"x size ({H}*{W}) are not even."

    BH2 = B * (H // 2)
    W2 = W // 2
    C2 = 2 * C

    # Free (contiguous) reshape: (B, H, W, C) -> (B*H/2, 2, W/2, 2C).
    #   dim1 = h parity; last dim = [even-w channels | odd-w channels].
    xv = x.reshape(BH2, 2, W2, C2)

    f32 = jnp.float32
    g = gamma.astype(f32)
    b = beta.astype(f32)
    w = w_t.astype(f32)

    # Fold LN affine into the weight: y @ W  with  y = (x-mu)*rstd*g + b
    #   == ((x-mu)*rstd) @ (diag(g) @ W) + (b @ W)
    wg = w * g[:, None]                 # (4C, 2C)
    bw = (b @ w).reshape(1, C2)         # (1, 2C), stays f32

    # Split weight rows to match the fused parity-plane channel layout:
    #   even-h channels = [x0 | x2] -> merged rows [0:C] ++ [2C:3C]
    #   odd-h  channels = [x1 | x3] -> merged rows [C:2C] ++ [3C:4C]
    w_ev = jnp.concatenate([wg[0:C], wg[2 * C:3 * C]], axis=0).astype(mxu_dtype)
    w_od = jnp.concatenate([wg[C:2 * C], wg[3 * C:4 * C]], axis=0).astype(mxu_dtype)

    tr, steps, padded = _choose_tiling(BH2, W2, target_rows)
    if padded != BH2:
        xv = jnp.pad(xv, ((0, padded - BH2), (0, 0), (0, 0), (0, 0)))

    out = pl.pallas_call(
        _patch_merge_kernel,
        out_shape=jax.ShapeDtypeStruct((padded, W2, C2), x.dtype),
        grid_spec=pltpu.PrefetchScalarGridSpec(
            num_scalar_prefetch=0,
            grid=(steps,),
            in_specs=[
                # Both h-parity planes in ONE contiguous block per step.
                pl.BlockSpec((tr, 2, W2, C2), lambda i: (i, 0, 0, 0)),
                # Grid-invariant params (fetched once; no re-DMA across steps).
                pl.BlockSpec((C2, C2), lambda i: (0, 0)),
                pl.BlockSpec((C2, C2), lambda i: (0, 0)),
                pl.BlockSpec((1, C2), lambda i: (0, 0)),
            ],
            out_specs=pl.BlockSpec((tr, W2, C2), lambda i: (i, 0, 0)),
        ),
        compiler_params=pltpu.CompilerParams(
            dimension_semantics=("parallel",),
            vmem_limit_bytes=48 * 1024 * 1024,
        ),
    )(xv, w_ev, w_od, bw)

    if padded != BH2:
        out = out[:BH2]
    return out.reshape(B, (H // 2) * W2, C2)


def _reference(x, gamma, beta, w_t, input_resolution):
    """Pure-JAX reference mirroring the PyTorch forward (f32)."""
    H, W = input_resolution
    B, L, C = x.shape
    xr = x.reshape(B, H, W, C).astype(jnp.float32)
    x0 = xr[:, 0::2, 0::2, :]
    x1 = xr[:, 1::2, 0::2, :]
    x2 = xr[:, 0::2, 1::2, :]
    x3 = xr[:, 1::2, 1::2, :]
    xm = jnp.concatenate([x0, x1, x2, x3], axis=-1).reshape(B, -1, 4 * C)
    mean = jnp.mean(xm, axis=-1, keepdims=True)
    var = jnp.mean((xm - mean) ** 2, axis=-1, keepdims=True)
    y = (xm - mean) / jnp.sqrt(var + LN_EPS) * gamma + beta
    return jnp.einsum("blk,kn->bln", y, w_t.astype(jnp.float32))


if __name__ == "__main__":
    # Small, Swin-flavored shapes: B=2, H=W=16, dim=C=32  ->  x: (2, 256, 32)
    B, H, W, C = 2, 16, 16, 32
    key = jax.random.PRNGKey(0)
    kx, kg, kb, kw = jax.random.split(key, 4)

    x = jax.random.normal(kx, (B, H * W, C), dtype=jnp.float32)
    gamma = 1.0 + 0.02 * jax.random.normal(kg, (4 * C,), dtype=jnp.float32)
    beta = 0.02 * jax.random.normal(kb, (4 * C,), dtype=jnp.float32)
    # torch Linear weight is (out=2C, in=4C); we store it transposed (4C, 2C).
    w_t = (jax.random.normal(kw, (4 * C, 2 * C), dtype=jnp.float32)
           / jnp.sqrt(4.0 * C))

    ref = _reference(x, gamma, beta, w_t, (H, W))

    # Exact-semantics path: f32 MXU operands, tight tolerance vs reference.
    run_f32 = jax.jit(functools.partial(
        patch_merging, input_resolution=(H, W), mxu_dtype=jnp.float32))
    out_f32 = jax.block_until_ready(run_f32(x, gamma, beta, w_t))
    assert out_f32.shape == (B, (H // 2) * (W // 2), 2 * C), out_f32.shape
    assert jnp.allclose(out_f32, ref, atol=1e-4, rtol=1e-4), "f32 path mismatch"

    # Fast path: bf16 MXU weights, f32 accumulation.
    run_bf16 = jax.jit(functools.partial(
        patch_merging, input_resolution=(H, W), mxu_dtype=jnp.bfloat16))
    out_bf16 = jax.block_until_ready(run_bf16(x, gamma, beta, w_t))
    assert out_bf16.shape == (B, (H // 2) * (W // 2), 2 * C), out_bf16.shape
    assert jnp.allclose(out_bf16, ref, atol=3e-2, rtol=3e-2), "bf16 path mismatch"

    # Fastest path: bf16 activation I/O too (kernel is HBM-bound -> ~2x traffic win).
    out_bf16io = jax.block_until_ready(run_bf16(x.astype(jnp.bfloat16), gamma, beta, w_t))
    assert out_bf16io.dtype == jnp.bfloat16
    assert jnp.allclose(out_bf16io.astype(jnp.float32), ref, atol=1e-1, rtol=1e-1), \
        "bf16 I/O path mismatch"

    print("KERNEL_OK")
</pallas_src>

<mosaic_0001>
module attributes {stable_mosaic.version = 11 : i64} {
  func.func @_patch_merge_kernel(%arg0: i32, %arg1: memref<8x2x8x64xf32, #tpu.memory_space<vmem>>, %arg2: memref<64x64xf32, #tpu.memory_space<vmem>>, %arg3: memref<64x64xf32, #tpu.memory_space<vmem>>, %arg4: memref<1x64xf32, #tpu.memory_space<vmem>>, %arg5: memref<8x8x64xf32, #tpu.memory_space<vmem>>) attributes {dimension_semantics = [#tpu.dimension_semantics<parallel>], iteration_bounds = array<i64: 2>, scalar_prefetch = 0 : i64, scratch_operands = 0 : i64, tpu.core_type = #tpu.core_type<tc>, window_params = [{transform_indices = @transform_0, window_bounds = array<i64: 8, 2, 8, 64>}, {pipeline_mode = #tpu.pipeline_mode<synchronous>, transform_indices = @transform_1, window_bounds = array<i64: 64, 64>}, {pipeline_mode = #tpu.pipeline_mode<synchronous>, transform_indices = @transform_2, window_bounds = array<i64: 64, 64>}, {pipeline_mode = #tpu.pipeline_mode<synchronous>, transform_indices = @transform_3, window_bounds = array<i64: 1, 64>}, {transform_indices = @transform_4, window_bounds = array<i64: 8, 8, 64>}]} {
    %c0 = arith.constant 0 : index
    %c0_0 = arith.constant 0 : index
    %c0_1 = arith.constant 0 : index
    %c0_2 = arith.constant 0 : index
    %0 = vector.load %arg1[%c0, %c0_0, %c0_1, %c0_2] : memref<8x2x8x64xf32, #tpu.memory_space<vmem>>, vector<8x1x8x64xf32>
    %1 = vector.shape_cast %0 : vector<8x1x8x64xf32> to vector<8x8x64xf32>
    %c0_3 = arith.constant 0 : index
    %c1 = arith.constant 1 : index
    %c0_4 = arith.constant 0 : index
    %c0_5 = arith.constant 0 : index
    %2 = vector.load %arg1[%c0_3, %c1, %c0_4, %c0_5] : memref<8x2x8x64xf32, #tpu.memory_space<vmem>>, vector<8x1x8x64xf32>
    %3 = vector.shape_cast %2 : vector<8x1x8x64xf32> to vector<8x8x64xf32>
    %cst = arith.constant dense<0.000000e+00> : vector<8x8xf32>
    %4 = vector.multi_reduction <add>, %1, %cst [2] : vector<8x8x64xf32> to vector<8x8xf32>
    %5 = vector.shape_cast %4 : vector<8x8xf32> to vector<8x8x1xf32>
    %cst_6 = arith.constant dense<0.000000e+00> : vector<8x8xf32>
    %6 = vector.multi_reduction <add>, %3, %cst_6 [2] : vector<8x8x64xf32> to vector<8x8xf32>
    %7 = vector.shape_cast %6 : vector<8x8xf32> to vector<8x8x1xf32>
    %8 = arith.addf %5, %7 : vector<8x8x1xf32>
    %9 = arith.mulf %1, %1 : vector<8x8x64xf32>
    %cst_7 = arith.constant dense<0.000000e+00> : vector<8x8xf32>
    %10 = vector.multi_reduction <add>, %9, %cst_7 [2] : vector<8x8x64xf32> to vector<8x8xf32>
    %11 = vector.shape_cast %10 : vector<8x8xf32> to vector<8x8x1xf32>
    %12 = arith.mulf %3, %3 : vector<8x8x64xf32>
    %cst_8 = arith.constant dense<0.000000e+00> : vector<8x8xf32>
    %13 = vector.multi_reduction <add>, %12, %cst_8 [2] : vector<8x8x64xf32> to vector<8x8xf32>
    %14 = vector.shape_cast %13 : vector<8x8xf32> to vector<8x8x1xf32>
    %15 = arith.addf %11, %14 : vector<8x8x1xf32>
    %cst_9 = arith.constant 7.812500e-03 : f32
    %16 = vector.broadcast %cst_9 : f32 to vector<8x8x1xf32>
    %17 = arith.mulf %8, %16 : vector<8x8x1xf32>
    %cst_10 = arith.constant 7.812500e-03 : f32
    %18 = vector.broadcast %cst_10 : f32 to vector<8x8x1xf32>
    %19 = arith.mulf %15, %18 : vector<8x8x1xf32>
    %20 = arith.mulf %17, %17 : vector<8x8x1xf32>
    %21 = arith.subf %19, %20 : vector<8x8x1xf32>
    %cst_11 = arith.constant 0.000000e+00 : f32
    %22 = vector.broadcast %cst_11 : f32 to vector<8x8x1xf32>
    %23 = arith.maximumf %21, %22 : vector<8x8x1xf32>
    %cst_12 = arith.constant 9.99999974E-6 : f32
    %24 = vector.broadcast %cst_12 : f32 to vector<8x8x1xf32>
    %25 = arith.addf %23, %24 : vector<8x8x1xf32>
    %26 = math.rsqrt %25 : vector<8x8x1xf32>
    %c0_13 = arith.constant 0 : index
    %c0_14 = arith.constant 0 : index
    %27 = vector.load %arg2[%c0_13, %c0_14] : memref<64x64xf32, #tpu.memory_space<vmem>>, vector<64x64xf32>
    %c0_15 = arith.constant 0 : index
    %c0_16 = arith.constant 0 : index
    %28 = vector.load %arg3[%c0_15, %c0_16] : memref<64x64xf32, #tpu.memory_space<vmem>>, vector<64x64xf32>
    %29 = vector.broadcast %17 : vector<8x8x1xf32> to vector<8x8x64xf32>
    %30 = arith.subf %1, %29 : vector<8x8x64xf32>
    %31 = vector.broadcast %26 : vector<8x8x1xf32> to vector<8x8x64xf32>
    %32 = arith.mulf %30, %31 : vector<8x8x64xf32>
    %33 = vector.shape_cast %32 : vector<8x8x64xf32> to vector<64x64xf32>
    %34 = vector.broadcast %17 : vector<8x8x1xf32> to vector<8x8x64xf32>
    %35 = arith.subf %3, %34 : vector<8x8x64xf32>
    %36 = vector.broadcast %26 : vector<8x8x1xf32> to vector<8x8x64xf32>
    %37 = arith.mulf %35, %36 : vector<8x8x64xf32>
    %38 = vector.shape_cast %37 : vector<8x8x64xf32> to vector<64x64xf32>
    %cst_17 = arith.constant dense<0.000000e+00> : vector<64x64xf32>
    %39 = tpu.matmul %33, %27, %cst_17 {dimension_numbers = #tpu.dot_dimension_numbers<[1], [0], [0], [1], [0, 0, 1, 1], [], []>} : vector<64x64xf32>, vector<64x64xf32>, vector<64x64xf32> -> vector<64x64xf32>
    %cst_18 = arith.constant dense<0.000000e+00> : vector<64x64xf32>
    %40 = tpu.matmul %38, %28, %cst_18 {dimension_numbers = #tpu.dot_dimension_numbers<[1], [0], [0], [1], [0, 0, 1, 1], [], []>} : vector<64x64xf32>, vector<64x64xf32>, vector<64x64xf32> -> vector<64x64xf32>
    %41 = arith.addf %39, %40 : vector<64x64xf32>
    %c0_19 = arith.constant 0 : index
    %c0_20 = arith.constant 0 : index
    %42 = vector.load %arg4[%c0_19, %c0_20] : memref<1x64xf32, #tpu.memory_space<vmem>>, vector<1x64xf32>
    %43 = vector.broadcast %42 : vector<1x64xf32> to vector<64x64xf32>
    %44 = arith.addf %41, %43 : vector<64x64xf32>
    %45 = vector.shape_cast %44 : vector<64x64xf32> to vector<8x8x64xf32>
    %c0_21 = arith.constant 0 : index
    %c0_22 = arith.constant 0 : index
    %c0_23 = arith.constant 0 : index
    %46 = vector.load %arg5[%c0_21, %c0_22, %c0_23] : memref<8x8x64xf32, #tpu.memory_space<vmem>>, vector<8x8x64xf32>
    tpu.vector_store %arg5[%c0_21, %c0_22, %c0_23], %45 {strides = array<i32>} : memref<8x8x64xf32, #tpu.memory_space<vmem>>, vector<8x8x64xf32>,
    return
  }
  func.func @transform_0(%arg0: i32) -> (i32, i32, i32, i32) {
    %c0_i32 = arith.constant 0 : i32
    %c0_i32_0 = arith.constant 0 : i32
    %c0_i32_1 = arith.constant 0 : i32
    %c0_i32_2 = arith.constant 0 : i32
    return %arg0, %c0_i32, %c0_i32_0, %c0_i32_1 : i32, i32, i32, i32
  }
  func.func @transform_1(%arg0: i32) -> (i32, i32) {
    %c0_i32 = arith.constant 0 : i32
    %c0_i32_0 = arith.constant 0 : i32
    %c0_i32_1 = arith.constant 0 : i32
    return %c0_i32, %c0_i32_0 : i32, i32
  }
  func.func @transform_2(%arg0: i32) -> (i32, i32) {
    %c0_i32 = arith.constant 0 : i32
    %c0_i32_0 = arith.constant 0 : i32
    %c0_i32_1 = arith.constant 0 : i32
    return %c0_i32, %c0_i32_0 : i32, i32
  }
  func.func @transform_3(%arg0: i32) -> (i32, i32) {
    %c0_i32 = arith.constant 0 : i32
    %c0_i32_0 = arith.constant 0 : i32
    %c0_i32_1 = arith.constant 0 : i32
    return %c0_i32, %c0_i32_0 : i32, i32
  }
  func.func @transform_4(%arg0: i32) -> (i32, i32, i32) {
    %c0_i32 = arith.constant 0 : i32
    %c0_i32_0 = arith.constant 0 : i32
    %c0_i32_1 = arith.constant 0 : i32
    return %arg0, %c0_i32, %c0_i32_0 : i32, i32, i32
  }
}

</mosaic_0001>

<bundles_post_ra>
// kernel: patch_merging.1
= control target key start
LH: loop header
LB: loop body
LE: loop exit
PB: predicated region body
PF: predicated region fallthrough
CT: control target
= control target key end

     0   :  { %9 = vsyncpa [#allocation3], 0  ;;  %s1476_s0 = inlined_call_operand.vmem [shape: f32[16,2,8,64], index: 0, kind: input, shape index: {}]   ;;  %s1477_s1 = inlined_call_operand.vmem [shape: f32[64,64], index: 1, kind: input, shape index: {}]   ;;  %s1478_s2 = inlined_call_operand.vmem [shape: f32[64,64], index: 2, kind: input, shape index: {}]   ;;  %s1479_s3 = inlined_call_operand.vmem [shape: f32[1,64], index: 3, kind: input, shape index: {}]   ;;  %s1480_s4 = inlined_call_operand.hbm [shape: f32[16,8,64], index: 4, kind: output, shape index: {}]  }
   0x1   :  { %11 = vsyncpa [#allocation3 + $0x1], 0  ;;  %s1126_s15 = smov 0   ;;  %s1128_s16 = smov 0  }
   0x2   :  { %s1130_s17 = smov 0   ;;  %s1132_s18 = smov 0  }
   0x3 LB: > { %s1147_s19 = sadd.s32 4294967295, %s1096_s18   ;;  %s809_s20 = sadd.s32 4294967294, %s1096_s18   ;;  %s1096_s18 = sphi %s1132_s18, %s1486_s18   ;;  %s1092_s17 = sphi %s1130_s17, %s1485_s17   ;;  %s1088_s16 = sphi %s1128_s16, %s1484_s16   ;;  %s1084_s15 = sphi %s1126_s15, %s1483_s15  }
   0x4   : > { %s1151_s21 = sadd.s32 1, %s1096_s18   ;;  %s113_s22 = sadd.s32 1, %s1092_s17 }
   0x5   : > { %s110_s23 = ssub.s32 %s1096_s18, %s1151_s21  ;;  %p123_p0 = scmp.ne.s32.totalorder %s1092_s17, %s1088_s16 }
   0x6   : > { %p111_p1 = scmp.eq.s32.totalorder %s110_s23, 0  ;;  %p124_p2 = scmp.eq.s32.totalorder %s1147_s19, 1 }
   0x7   : > { %p129_p3 = scmp.ne.s32.totalorder %s1088_s16, %s1084_s15  ;;  %p130_p4 = scmp.eq.s32.totalorder %s809_s20, 1 }
   0x8   : > { %s1162_s24 = scalar_select %p111_p1, %s1092_s17, %s113_s22  }
   0x9   : > { %p1164_p5 = por %p124_p2, %p123_p0  ;;  %p1168_p6 = por %p130_p4, %p129_p3 }
   0xa   : > { %p812_p7 = scmp.ge.s32.totalorder %s1096_s18, 1  ;;  %p167_p8 = scmp.lt.s32.totalorder %s1096_s18, 3 }
   0xc   : > { %p168_p9 = pnand %p812_p7, %p167_p8 }
   0xd   : > { %s814_s27 = sshll.u32 (!%p168_p9), %s1147_s19, 3  ;;  %vm219_vm0 = vcmask (!%p168_p9), 523264   ;;  %v412_v38 = vld [vmem:[%s1478_s2] sm:$0xff] (!%p168_p9)  ;;  %v413_v39 = vld [vmem:[%s1478_s2 + $0x8] sm:$0xff] (!%p168_p9)  ;;  %v414_v48 = vld [vmem:[%s1478_s2 + $0x10] sm:$0xff] (!%p168_p9)  ;;  %s848_s10 = sshll.u32 (!%p168_p9), %s1147_s19, 10 }
   0xe   : > { %171 = sbr.rel (%p168_p9) target bundleno = 483 (0x1e3), region = 36  ;;  %p195_p10 = scmp.lt.s32.totalorder (!%p168_p9), %s814_s27, 15  ;;  %v404_v40 = vld [vmem:[%s1477_s1] sm:$0xff] (!%p168_p9)  ;;  %v937_v42 = vpack.c.bf16 (!%p168_p9), %v413_v39, %v412_v38  ;;  %v405_v43 = vld [vmem:[%s1477_s1 + $0x8] sm:$0xff] (!%p168_p9)  ;;  %v415_v49 = vld [vmem:[%s1478_s2 + $0x18] sm:$0xff] (!%p168_p9) }
   0xf   : > { %v953_v47 = vpack.c.bf16 (!%p168_p9), %v405_v43, %v404_v40  ;;  %v406_v50 = vld [vmem:[%s1477_s1 + $0x10] sm:$0xff] (!%p168_p9)  ;;  %v941_v52 = vpack.c.bf16 (!%p168_p9), %v415_v49, %v414_v48  ;;  %v407_v53 = vld [vmem:[%s1477_s1 + $0x18] sm:$0xff] (!%p168_p9)  ;;  %v416_v58 = vld [vmem:[%s1478_s2 + $0x20] sm:$0xff] (!%p168_p9)  ;;  %s1425_s14 = scalar_lea.hbm (!%p168_p9), %s1480_s4, %s848_s10  ;;  %s1098_s22 = smov (!%p168_p9), [#allocation2]  }
  0x10   : > { %938 = vmatprep.subr.bf16.mxu1 (!%p168_p9), %v937_v42  ;;  %v957_v57 = vpack.c.bf16 (!%p168_p9), %v407_v53, %v406_v50  ;;  %v417_v59 = vld [vmem:[%s1478_s2 + $0x28] sm:$0xff] (!%p168_p9)  ;;  %v408_v60 = vld [vmem:[%s1477_s1 + $0x20] sm:$0xff] (!%p168_p9)  ;;  %s1038_s23 = sshll.u32 (!%p168_p9), %s1098_s22, 4  ;;  %s1039_s23 = int_to_ptr.vmem [resolvable:$false] %s1038_s23 }
  0x11   : > { %954 = vmatprep.subr.bf16.mxu0 (!%p168_p9), %v953_v47  ;;  %940 = vmatpush3.bf16.msra.mxu1 (!%p168_p9), %v937_v42  ;;  %v945_v61 = vpack.c.bf16 (!%p168_p9), %v417_v59, %v416_v58  ;;  %v409_v62 = vld [vmem:[%s1477_s1 + $0x28] sm:$0xff] (!%p168_p9) }
  0x12   : > { %956 = vmatpush3.bf16.msra.mxu0 (!%p168_p9), %v953_v47  ;;  %942 = vmatprep.subr.bf16.mxu1 (!%p168_p9), %v941_v52 }
  0x13   : > { %958 = vmatprep.subr.bf16.mxu0 (!%p168_p9), %v957_v57 }
  0x15   : > { %s1488_s27 = smov (!%p195_p10, %s814_s27), 15  ;;  %944 = vmatpush3.bf16.msra.mxu1 %v941_v52 }
  0x16   : > { %s847_s28 = sshll.u32 %s1488_s27, 4  ;;  %960 = vmatpush3.bf16.msra.mxu0 %v957_v57  ;;  %946 = vmatprep.subr.bf16.mxu1 %v945_v61  ;;  %s1040_s27 = scalar_lea.vmem %s1039_s23, 2048 }
  0x17   : > { %s1178_s5 = scalar_lea.vmem %s1476_s0, %s847_s28 }
  0x18   : > { %v1181_v0 = vld [vmem:[%s1178_s5 + $0x10] sm:$0xff]  ;;  %v1184_v1 = vld [vmem:[%s1178_s5] sm:$0xff]  ;;  %v1187_v2 = vld [vmem:[%s1178_s5 + $0x18] sm:$0xff] }
  0x19   : > { %v223_v3 = vsel %vm219_vm0, %v1181_v0, 0.0  ;;  %v220_v4 = vsel %vm219_vm0, %v1184_v1, 0.0  ;;  %v1194_v5 = vld [vmem:[%s1178_s5 + $0x8] sm:$0xff]  ;;  %v247_v6 = vsel %vm219_vm0, %v1187_v2, 0.0  ;;  %v276_v9 = vmul.f32 %v1184_v1, %v1184_v1  ;;  %v1216_v17 = vld [vmem:[%s1178_s5 + $0x20] sm:$0xff]  ;;  %v1223_v20 = vld [vmem:[%s1178_s5 + $0x38] sm:$0xff]  ;;  %948 = vmatpush3.bf16.msra.mxu1 %v945_v61 }
  0x1a   : > { %224 = vadd.xlane.f32.xlu1 %v223_v3  ;;  %221 = vadd.xlane.f32.xlu0 %v220_v4  ;;  %v244_v7 = vsel %vm219_vm0, %v1194_v5, 0.0  ;;  %v308_v8 = vmul.f32 %v1194_v5, %v1194_v5  ;;  %v309_v12 = vmul.f32 %v1187_v2, %v1187_v2  ;;  %v277_v13 = vmul.f32 %v1181_v0, %v1181_v0  ;;  %v1213_v16 = vld [vmem:[%s1178_s5 + $0x28] sm:$0xff]  ;;  %v1226_v21 = vld [vmem:[%s1178_s5 + $0x30] sm:$0xff]  ;;  %v1248_v33 = vld [vmem:[%s1178_s5 + $0x40] sm:$0xff] }
  0x1b   : > { %v284_v11 = vsel %vm219_vm0, %v276_v9, 0.0  ;;  %v250_v18 = vsel %vm219_vm0, %v1213_v16, 0.0  ;;  %v226_v19 = vsel %vm219_vm0, %v1216_v17, 0.0  ;;  %v253_v22 = vsel %vm219_vm0, %v1223_v20, 0.0  ;;  %v1245_v32 = vld [vmem:[%s1178_s5 + $0x48] sm:$0xff]  ;;  %v1255_v36 = vld [vmem:[%s1178_s5 + $0x58] sm:$0xff] }
  0x1c   : > { %v316_v10 = vsel %vm219_vm0, %v308_v8, 0.0  ;;  %v319_v14 = vsel %vm219_vm0, %v309_v12, 0.0  ;;  %v287_v15 = vsel %vm219_vm0, %v277_v13, 0.0  ;;  %v229_v23 = vsel %vm219_vm0, %v1226_v21, 0.0  ;;  %v1258_v37 = vld [vmem:[%s1178_s5 + $0x50] sm:$0xff]  ;;  %v419_v9 = vld [vmem:[%s1478_s2 + $0x38] sm:$0xff] }
  0x1d   : > { %v310_v24 = vmul.f32 %v1213_v16, %v1213_v16  ;;  %v278_v25 = vmul.f32 %v1216_v17, %v1216_v17  ;;  %v311_v28 = vmul.f32 %v1223_v20, %v1223_v20  ;;  %v279_v29 = vmul.f32 %v1226_v21, %v1226_v21  ;;  %v418_v8 = vld [vmem:[%s1478_s2 + $0x30] sm:$0xff]  ;;  %v411_v12 = vld [vmem:[%s1477_s1 + $0x38] sm:$0xff] }
  0x1e   : > { %248 = vadd.xlane.f32.xlu1 %v247_v6  ;;  %245 = vadd.xlane.f32.xlu0 %v244_v7  ;;  %v256_v34 = vsel %vm219_vm0, %v1245_v32, 0.0  ;;  %v232_v35 = vsel %vm219_vm0, %v1248_v33, 0.0  ;;  %v259_v41 = vsel %vm219_vm0, %v1255_v36, 0.0  ;;  %v235_v44 = vsel %vm219_vm0, %v1258_v37, 0.0  ;;  %v1313_v6 = vld [vmem:[%s1178_s5 + $0x68] sm:$0xff]  ;;  %v1316_v7 = vld [vmem:[%s1178_s5 + $0x60] sm:$0xff] }
  0x1f   : > { %v322_v26 = vsel %vm219_vm0, %v310_v24, 0.0  ;;  %v290_v27 = vsel %vm219_vm0, %v278_v25, 0.0  ;;  %v325_v30 = vsel %vm219_vm0, %v311_v28, 0.0  ;;  %v293_v31 = vsel %vm219_vm0, %v279_v29, 0.0 }
  0x20   : > { %v312_v45 = vmul.f32 %v1245_v32, %v1245_v32  ;;  %v280_v46 = vmul.f32 %v1248_v33, %v1248_v33  ;;  %v313_v51 = vmul.f32 %v1255_v36, %v1255_v36  ;;  %v281_v56 = vmul.f32 %v1258_v37, %v1258_v37 }
  0x21   : > { %v961_v4 = vpack.c.bf16 %v409_v62, %v408_v60  ;;  %v262_v13 = vsel %vm219_vm0, %v1313_v6, 0.0  ;;  %v314_v24 = vmul.f32 %v1313_v6, %v1313_v6  ;;  %v282_v25 = vmul.f32 %v1316_v7, %v1316_v7 }
  0x22   : > { %317 = vadd.xlane.f32.xlu1 %v316_v10  ;;  %285 = vadd.xlane.f32.xlu0 %v284_v11  ;;  %v328_v54 = vsel %vm219_vm0, %v312_v45, 0.0  ;;  %v296_v55 = vsel %vm219_vm0, %v280_v46, 0.0  ;;  %v331_v63 = vsel %vm219_vm0, %v313_v51, 0.0  ;;  %v299_v3 = vsel %vm219_vm0, %v281_v56, 0.0  ;;  %v410_v10 = vld [vmem:[%s1477_s1 + $0x30] sm:$0xff] }
  0x23   : > { %962 = vmatprep.subr.bf16.mxu0 %v961_v4  ;;  %v949_v11 = vpack.c.bf16 %v419_v9, %v418_v8 }
  0x24   : > { %964 = vmatpush3.bf16.msra.mxu0 %v961_v4 }
  0x25   : > { %950 = vmatprep.subr.bf16.mxu1 %v949_v11 }
  0x26   : > { %320 = vadd.xlane.f32.xlu1 %v319_v14  ;;  %288 = vadd.xlane.f32.xlu0 %v287_v15  ;;  %v238_v14 = vsel %vm219_vm0, %v1316_v7, 0.0  ;;  %v965_v15 = vpack.c.bf16 %v411_v12, %v410_v10 }
  0x27   : > { %952 = vmatpush3.bf16.msra.mxu1 %v949_v11 }
  0x28   : > { %966 = vmatprep.subr.bf16.mxu0 %v965_v15 }
  0x29   : > { %968 = vmatpush3.bf16.msra.mxu0 %v965_v15 }
  0x2a   : > { %251 = vadd.xlane.f32.xlu1 %v250_v18  ;;  %227 = vadd.xlane.f32.xlu0 %v226_v19  ;;  %v1335_v18 = vld [vmem:[%s1178_s5 + $0x78] sm:$0xff]  ;;  %v1338_v19 = vld [vmem:[%s1178_s5 + $0x70] sm:$0xff]  ;;  %s191_s5 = sand.u32 1, %s1088_s16  }
  0x2b   : > { %v315_v28 = vmul.f32 %v1335_v18, %v1335_v18  ;;  %v283_v29 = vmul.f32 %v1338_v19, %v1338_v19  ;;  %s813_s6 = sshll.u32 %s191_s5, 6  ;;  %s1435_s19 = scalar_lea.sflag [#allocation3], %s191_s5 }
  0x2c   : > { %s1406_s9 = scalar_lea.vmem [#allocation2], %s813_s6 }
  0x2d   : > { %s747_s11 = sshll.u32 %s1406_s9, 4  ;;  %s1427_s11 = int_to_ptr.vmem [resolvable:$true] %s747_s11 }
  0x2e   : > { %254 = vadd.xlane.f32.xlu1 %v253_v22  ;;  %230 = vadd.xlane.f32.xlu0 %v229_v23  ;;  %v265_v22 = vsel %vm219_vm0, %v1335_v18, 0.0  ;;  %v241_v23 = vsel %vm219_vm0, %v1338_v19, 0.0  ;;  %s1034_s20 = scalar_lea.vmem %s1427_s11, 1024  ;;  %p1041_p0 = scmp.lt.s32.totalorder %s1427_s11, %s1039_s23 }
  0x2f   : > { %p1035_p11 = scmp.ne.s32.totalorder %s1427_s11, %s1034_s20  ;;  %p1042_p1 = scmp.lt.s32.totalorder %s1040_s27, %s1034_s20 }
  0x31   : > { %p1036_p12 = pnand %p1035_p11, %p1164_p5  ;;  %p1043_p2 = por %p1042_p1, %p1041_p0 }
  0x32   : > { %323 = vadd.xlane.f32.xlu1 %v322_v26  ;;  %291 = vadd.xlane.f32.xlu0 %v290_v27  ;;  %v334_v26 = vsel %vm219_vm0, %v314_v24, 0.0  ;;  %v302_v27 = vsel %vm219_vm0, %v282_v25, 0.0 }
  0x33   : > { %p1037_p13 = pneg %p1036_p12 }
  0x35   : > { %p1044_p3 = pnand %p1043_p2, %p1037_p13 }
  0x36   : > { %326 = vadd.xlane.f32.xlu1 %v325_v30  ;;  %294 = vadd.xlane.f32.xlu0 %v293_v31  ;;  %v337_v30 = vsel %vm219_vm0, %v315_v28, 0.0  ;;  %v305_v31 = vsel %vm219_vm0, %v283_v29, 0.0 }
  0x3a   : > { %257 = vadd.xlane.f32.xlu1 %v256_v34  ;;  %233 = vadd.xlane.f32.xlu0 %v232_v35 }
  0x3e   : > { %260 = vadd.xlane.f32.xlu1 %v259_v41  ;;  %236 = vadd.xlane.f32.xlu0 %v235_v44 }
  0x42   : > { %329 = vadd.xlane.f32.xlu1 %v328_v54  ;;  %297 = vadd.xlane.f32.xlu0 %v296_v55 }
  0x46   : > { %332 = vadd.xlane.f32.xlu1 %v331_v63  ;;  %300 = vadd.xlane.f32.xlu0 %v299_v3 }
  0x4a   : > { %263 = vadd.xlane.f32.xlu1 %v262_v13  ;;  %239 = vadd.xlane.f32.xlu0 %v238_v14 }
  0x4e   : > { %266 = vadd.xlane.f32.xlu1 %v265_v22  ;;  %242 = vadd.xlane.f32.xlu0 %v241_v23 }
  0x52   : > { %335 = vadd.xlane.f32.xlu1 %v334_v26  ;;  %303 = vadd.xlane.f32.xlu0 %v302_v27 }
  0x56   : > { %338 = vadd.xlane.f32.xlu1 %v337_v30  ;;  %306 = vadd.xlane.f32.xlu0 %v305_v31 }
  0xa7   : > { %v225_v34 = vpop.xlane.xlu1 %224  ;;  %v222_v35 = vpop.xlane.xlu0 %221 }
  0xab   : > { %v249_v38 = vpop.xlane.xlu1 %248  ;;  %v246_v39 = vpop.xlane.xlu0 %245 }
  0xac   : > { %v268_v40 = vadd.f32 %v246_v39, %v222_v35  ;;  %v269_v41 = vadd.f32 %v249_v38, %v225_v34 }
  0xae   : > { %v348_v42 = vmul.f32 0.0078125, %v268_v40  ;;  %v349_v46 = vmul.f32 0.0078125, %v269_v41 }
  0xaf   : > { %v318_v43 = vpop.xlane.xlu1 %317  ;;  %v286_v44 = vpop.xlane.xlu0 %285 }
  0xb0   : > { %v340_v45 = vadd.f32 %v318_v43, %v286_v44  ;;  %v364_v47 = vmul.f32 %v348_v42, %v348_v42  ;;  %v365_v54 = vmul.f32 %v349_v46, %v349_v46  ;;  %v436_v23 = vsub.f32 %v1194_v5, %v348_v42 }
  0xb1   : > { %v420_v24 = vsub.f32 %v1184_v1, %v348_v42  ;;  %v421_v35 = vsub.f32 %v1181_v0, %v349_v46  ;;  %v437_v38 = vsub.f32 %v1187_v2, %v349_v46 }
  0xb2   : > { %v356_v48 = vmul.f32 0.0078125, %v340_v45 }
  0xb3   : > { %v321_v49 = vpop.xlane.xlu1 %320  ;;  %v289_v50 = vpop.xlane.xlu0 %288 }
  0xb4   : > { %v372_v51 = vsub.f32 %v356_v48, %v364_v47  ;;  %v341_v52 = vadd.f32 %v321_v49, %v289_v50 }
  0xb6   : > { %v380_v53 = vmax.f32 %v372_v51, 0.0  ;;  %v357_v55 = vmul.f32 0.0078125, %v341_v52 }
  0xb7   : > { %v252_v56 = vpop.xlane.xlu1 %251  ;;  %v228_v57 = vpop.xlane.xlu0 %227 }
  0xb8   : > { %v388_v58 = vadd.f32 1e-05, %v380_v53  ;;  %v373_v59 = vsub.f32 %v357_v55, %v365_v54  ;;  %v270_v61 = vadd.f32 %v252_v56, %v228_v57 }
  0xba   : > { %1018 = vrsqrt.f32 %v388_v58  ;;  %v381_v60 = vmax.f32 %v373_v59, 0.0  ;;  %v350_v4 = vmul.f32 0.0078125, %v270_v61 }
  0xbb   : > { %v255_v62 = vpop.xlane.xlu1 %254  ;;  %v231_v63 = vpop.xlane.xlu0 %230 }
  0xbc   : > { %v389_v3 = vadd.f32 1e-05, %v381_v60  ;;  %v271_v8 = vadd.f32 %v255_v62, %v231_v63  ;;  %v366_v13 = vmul.f32 %v350_v4, %v350_v4  ;;  %v422_v55 = vsub.f32 %v1216_v17, %v350_v4 }
  0xbd   : > { %v438_v56 = vsub.f32 %v1213_v16, %v350_v4 }
  0xbe   : > { %1020 = vrsqrt.f32 %v389_v3  ;;  %v1356_v12 = vmul.f32 0.0078125, %v271_v8 }
  0xbf   : > { %v324_v9 = vpop.xlane.xlu1 %323  ;;  %v292_v10 = vpop.xlane.xlu0 %291 }
  0xc0   : > { %v342_v11 = vadd.f32 %v324_v9, %v292_v10  ;;  %v367_v31 = vmul.f32 %v1356_v12, %v1356_v12  ;;  %v423_v10 = vsub.f32 %v1226_v21, %v1356_v12  ;;  %v439_v17 = vsub.f32 %v1223_v20, %v1356_v12 }
  0xc2   : > { %v358_v14 = vmul.f32 0.0078125, %v342_v11 }
  0xc3   : > { %v327_v15 = vpop.xlane.xlu1 %326  ;;  %v295_v22 = vpop.xlane.xlu0 %294 }
  0xc4   : > { %v1019_v25 = vpop.eup %1018  ;;  %v374_v26 = vsub.f32 %v358_v14, %v366_v13  ;;  %v343_v27 = vadd.f32 %v327_v15, %v295_v22 }
  0xc5   : > { %v444_v28 = vmul.f32 %v1019_v25, %v436_v23  ;;  %v428_v29 = vmul.f32 %v1019_v25, %v420_v24 }
  0xc6   : > { %v382_v30 = vmax.f32 %v374_v26, 0.0  ;;  %v359_v34 = vmul.f32 0.0078125, %v343_v27 }
  0xc7   : > { %v258_v39 = vpop.xlane.xlu1 %257  ;;  %897 = vmatprep.mubr.msk.f32.mxu1 %vm219_vm0, %v444_v28  ;;  %925 = vmatprep.mubr.msk.f32.mxu0 %vm219_vm0, %v428_v29  ;;  %v234_v1 = vpop.xlane.xlu0 %233 }
  0xc8   : > { %v1021_v5 = vpop.eup %1020  ;;  %v390_v40 = vadd.f32 1e-05, %v382_v30  ;;  %v375_v41 = vsub.f32 %v359_v34, %v367_v31  ;;  %v272_v45 = vadd.f32 %v258_v39, %v234_v1 }
  0xc9   : > { %v445_v42 = vmul.f32 %v1021_v5, %v437_v38  ;;  %v429_v43 = vmul.f32 %v1021_v5, %v421_v35 }
  0xca   : > { %1022 = vrsqrt.f32 %v390_v40  ;;  %v383_v44 = vmax.f32 %v375_v41, 0.0  ;;  %v352_v46 = vmul.f32 0.0078125, %v272_v45 }
  0xcb   : > { %v261_v47 = vpop.xlane.xlu1 %260  ;;  %898 = vmatmul.mubr.msk.f32.vlgmr.msra.gmra.mrb[0].mxu1 %vm219_vm0, %v445_v42  ;;  %926 = vmatmul.mubr.msk.f32.vlgmr.msra.gmra.mrb[0].mxu0 %vm219_vm0, %v429_v43  ;;  %v237_v0 = vpop.xlane.xlu0 %236 }
  0xcc   : > { %v391_v2 = vadd.f32 1e-05, %v383_v44  ;;  %v273_v48 = vadd.f32 %v261_v47, %v237_v0  ;;  %v368_v53 = vmul.f32 %v352_v46, %v352_v46  ;;  %v424_v35 = vsub.f32 %v1248_v33, %v352_v46 }
  0xcd   : > { %v440_v38 = vsub.f32 %v1245_v32, %v352_v46 }
  0xce   : > { %1024 = vrsqrt.f32 %v391_v2  ;;  %v1368_v52 = vmul.f32 0.0078125, %v273_v48 }
  0xcf   : > { %v330_v49 = vpop.xlane.xlu1 %329  ;;  %v298_v50 = vpop.xlane.xlu0 %297 }
  0xd0   : > { %v344_v51 = vadd.f32 %v330_v49, %v298_v50  ;;  %v369_v8 = vmul.f32 %v1368_v52, %v1368_v52  ;;  %v425_v0 = vsub.f32 %v1258_v37, %v1368_v52  ;;  %v441_v2 = vsub.f32 %v1255_v36, %v1368_v52 }
  0xd2   : > { %v360_v54 = vmul.f32 0.0078125, %v344_v51 }
  0xd3   : > { %v333_v57 = vpop.xlane.xlu1 %332  ;;  %v301_v58 = vpop.xlane.xlu0 %300 }
  0xd4   : > { %v1023_v59 = vpop.eup %1022  ;;  %v376_v60 = vsub.f32 %v360_v54, %v368_v53  ;;  %v345_v61 = vadd.f32 %v333_v57, %v301_v58 }
  0xd5   : > { %v446_v62 = vmul.f32 %v1023_v59, %v438_v56  ;;  %v430_v63 = vmul.f32 %v1023_v59, %v422_v55 }
  0xd6   : > { %v384_v3 = vmax.f32 %v376_v60, 0.0  ;;  %v361_v9 = vmul.f32 0.0078125, %v345_v61 }
  0xd7   : > { %v264_v11 = vpop.xlane.xlu1 %263  ;;  %900 = vmatprep.mubr.msk.f32.mxu1 %vm219_vm0, %v446_v62  ;;  %928 = vmatprep.mubr.msk.f32.mxu0 %vm219_vm0, %v430_v63  ;;  %v240_v16 = vpop.xlane.xlu0 %239 }
  0xd8   : > { %v1025_v4 = vpop.eup %1024  ;;  %v392_v13 = vadd.f32 1e-05, %v384_v3  ;;  %v377_v14 = vsub.f32 %v361_v9, %v369_v8  ;;  %v274_v24 = vadd.f32 %v264_v11, %v240_v16 }
  0xd9   : > { %v447_v15 = vmul.f32 %v1025_v4, %v439_v17  ;;  %v431_v22 = vmul.f32 %v1025_v4, %v423_v10 }
  0xda   : > { %1026 = vrsqrt.f32 %v392_v13  ;;  %v385_v23 = vmax.f32 %v377_v14, 0.0  ;;  %v354_v12 = vmul.f32 0.0078125, %v274_v24 }
  0xdb   : > { %v267_v25 = vpop.xlane.xlu1 %266  ;;  %901 = vmatmul.mubr.msk.f32.gmra.mrb[2].mxu1 %vm219_vm0, %v447_v15  ;;  %929 = vmatmul.mubr.msk.f32.gmra.mrb[2].mxu0 %vm219_vm0, %v431_v22  ;;  %v243_v20 = vpop.xlane.xlu0 %242 }
  0xdc   : > { %v393_v21 = vadd.f32 1e-05, %v385_v23  ;;  %v275_v26 = vadd.f32 %v267_v25, %v243_v20  ;;  %v370_v31 = vmul.f32 %v354_v12, %v354_v12  ;;  %v426_v36 = vsub.f32 %v1316_v7, %v354_v12 }
  0xdd   : > { %v442_v37 = vsub.f32 %v1313_v6, %v354_v12 }
  0xde   : > { %1028 = vrsqrt.f32 %v393_v21  ;;  %v355_v30 = vmul.f32 0.0078125, %v275_v26 }
  0xdf   : > { %v336_v27 = vpop.xlane.xlu1 %335  ;;  %v304_v28 = vpop.xlane.xlu0 %303 }
  0xe0   : > { %v346_v29 = vadd.f32 %v336_v27, %v304_v28  ;;  %v371_v45 = vmul.f32 %v355_v30, %v355_v30  ;;  %v427_v55 = vsub.f32 %v1338_v19, %v355_v30  ;;  %v443_v56 = vsub.f32 %v1335_v18, %v355_v30  ;;  %v841_v18 = vld [vmem:[%s1479_s3] ss:$0 sm:$0xff] }
  0xe2   : > { %v362_v34 = vmul.f32 0.0078125, %v346_v29 }
  0xe3   : > { %v339_v39 = vpop.xlane.xlu1 %338  ;;  %v307_v1 = vpop.xlane.xlu0 %306 }
  0xe4   : > { %v1027_v5 = vpop.eup %1026  ;;  %v378_v40 = vsub.f32 %v362_v34, %v370_v31  ;;  %v347_v41 = vadd.f32 %v339_v39, %v307_v1 }
  0xe5   : > { %v448_v42 = vmul.f32 %v1027_v5, %v440_v38  ;;  %v432_v43 = vmul.f32 %v1027_v5, %v424_v35 }
  0xe6   : > { %v386_v44 = vmax.f32 %v378_v40, 0.0  ;;  %v363_v47 = vmul.f32 0.0078125, %v347_v41 }
  0xe7   : > { %903 = vmatprep.mubr.msk.f32.mxu1 %vm219_vm0, %v448_v42  ;;  %931 = vmatprep.mubr.msk.f32.mxu0 %vm219_vm0, %v432_v43 }
  0xe8   : > { %v1029_v32 = vpop.eup %1028  ;;  %v394_v33 = vadd.f32 1e-05, %v386_v44  ;;  %v379_v46 = vsub.f32 %v363_v47, %v371_v45 }
  0xe9   : > { %v449_v48 = vmul.f32 %v1029_v32, %v441_v2  ;;  %v433_v49 = vmul.f32 %v1029_v32, %v425_v0 }
  0xea   : > { %1030 = vrsqrt.f32 %v394_v33  ;;  %v387_v50 = vmax.f32 %v379_v46, 0.0 }
  0xeb   : > { %904 = vmatmul.mubr.msk.f32.gmra.mrb[4].mxu1 %vm219_vm0, %v449_v48  ;;  %932 = vmatmul.mubr.msk.f32.gmra.mrb[4].mxu0 %vm219_vm0, %v433_v49 }
  0xec   : > { %v395_v51 = vadd.f32 1e-05, %v387_v50 }
  0xee   : > { %1032 = vrsqrt.f32 %v395_v51 }
  0xf4   : > { %v1031_v52 = vpop.eup %1030 }
  0xf5   : > { %v450_v53 = vmul.f32 %v1031_v52, %v442_v37  ;;  %v434_v54 = vmul.f32 %v1031_v52, %v426_v36 }
  0xf7   : > { %906 = vmatprep.mubr.msk.f32.mxu1 %vm219_vm0, %v450_v53  ;;  %934 = vmatprep.mubr.msk.f32.mxu0 %vm219_vm0, %v434_v54 }
  0xf8   : > { %v1033_v57 = vpop.eup %1032 }
  0xf9   : > { %v451_v58 = vmul.f32 %v1033_v57, %v443_v56  ;;  %v435_v59 = vmul.f32 %v1033_v57, %v427_v55 }
  0xfb   : > { %907 = vmatmul.mubr.msk.f32.gmra.mrb[6].mxu1 %vm219_vm0, %v451_v58  ;;  %935 = vmatmul.mubr.msk.f32.gmra.mrb[6].mxu0 %vm219_vm0, %v435_v59 }
 0x19e   : > { %v899_v6 = vpop.f32.mrb[0].mxu1  ;;  %v927_v7 = vpop.f32.mrb[0].mxu0 }
 0x19f   : > { %v677_v19 = vadd.f32 %v927_v7, %v899_v6  ;;  %v542_v60 = vpop.f32.mrb[1].mxu1  ;;  %v671_v61 = vpop.f32.mrb[1].mxu0 }
 0x1a0   : > { %v672_v62 = vadd.f32 %v671_v61, %v542_v60 }
 0x1a1   : > { %v718_v63 = vadd.f32 %v841_v18, %v677_v19 }
 0x1a2   : > { %v717_v3 = vadd.f32 %v841_v18, %v672_v62 }
 0x1a3   : > { %726 = vst.msk [vmem:[%s1406_s9 + $0x8] sm:$0xff] %vm219_vm0, %v718_v63 }
 0x1a4   : > { %725 = vst.msk [vmem:[%s1406_s9] sm:$0xff] %vm219_vm0, %v717_v3 }
 0x1ae   : > { %v902_v8 = vpop.f32.mrb[2].mxu1  ;;  %v930_v9 = vpop.f32.mrb[2].mxu0 }
 0x1af   : > { %v687_v10 = vadd.f32 %v930_v9, %v902_v8  ;;  %v552_v17 = vpop.f32.mrb[3].mxu1  ;;  %v681_v11 = vpop.f32.mrb[3].mxu0 }
 0x1b0   : > { %v682_v16 = vadd.f32 %v681_v11, %v552_v17 }
 0x1b1   : > { %v720_v4 = vadd.f32 %v841_v18, %v687_v10 }
 0x1b2   : > { %v719_v13 = vadd.f32 %v841_v18, %v682_v16 }
 0x1b3   : > { %728 = vst.msk [vmem:[%s1406_s9 + $0x18] sm:$0xff] %vm219_vm0, %v720_v4 }
 0x1b4   : > { %727 = vst.msk [vmem:[%s1406_s9 + $0x10] sm:$0xff] %vm219_vm0, %v719_v13 }
 0x1be   : > { %v905_v14 = vpop.f32.mrb[4].mxu1  ;;  %v933_v15 = vpop.f32.mrb[4].mxu0 }
 0x1bf   : > { %v697_v22 = vadd.f32 %v933_v15, %v905_v14  ;;  %v562_v23 = vpop.f32.mrb[5].mxu1  ;;  %v691_v24 = vpop.f32.mrb[5].mxu0 }
 0x1c0   : > { %v692_v25 = vadd.f32 %v691_v24, %v562_v23 }
 0x1c1   : > { %v722_v20 = vadd.f32 %v841_v18, %v697_v22 }
 0x1c2   : > { %v721_v21 = vadd.f32 %v841_v18, %v692_v25 }
 0x1c3   : > { %730 = vst.msk [vmem:[%s1406_s9 + $0x28] sm:$0xff] %vm219_vm0, %v722_v20 }
 0x1c4   : > { %729 = vst.msk [vmem:[%s1406_s9 + $0x20] sm:$0xff] %vm219_vm0, %v721_v21 }
 0x1ce   : > { %v908_v12 = vpop.f32.mrb[6].mxu1  ;;  %v936_v26 = vpop.f32.mrb[6].mxu0 }
 0x1cf   : > { %v707_v27 = vadd.f32 %v936_v26, %v908_v12  ;;  %v572_v28 = vpop.f32.mrb[7].mxu1  ;;  %v701_v29 = vpop.f32.mrb[7].mxu0 }
 0x1d0   : > { %v702_v30 = vadd.f32 %v701_v29, %v572_v28 }
 0x1d1   : > { %v724_v31 = vadd.f32 %v841_v18, %v707_v27 }
 0x1d2   : > { %v723_v34 = vadd.f32 %v841_v18, %v702_v30 }
 0x1d3   : > { %732 = vst.msk [vmem:[%s1406_s9 + $0x38] sm:$0xff] %vm219_vm0, %v724_v31 }
 0x1d4   : > { %731 = vst.msk [vmem:[%s1406_s9 + $0x30] sm:$0xff] %vm219_vm0, %v723_v34 }
 0x1d5   : > { %1047 = shalt.err (!%p1044_p3)
}
 0x1d6   : > { %s1048_s28 = scalar_lea.hbm %s1425_s14, 1024  ;;  %s1052_s5 = scalar_lea.hbm %s1480_s4, 2048 }
 0x1d7   : > { %p1049_p4 = scmp.ne.s32.totalorder %s1425_s14, %s1048_s28  ;;  %p1053_p9 = scmp.lt.u32.totalorder %s1425_s14, %s1480_s4 }
 0x1d8   : > { %p1054_p10 = scmp.lt.u32.totalorder %s1052_s5, %s1048_s28  ;;  %p1056_p12 = scmp.lt.u32.totalorder %s1048_s28, %s1425_s14 }
 0x1d9   : > { %p1050_p7 = pnand %p1049_p4, %p1164_p5 }
 0x1da   : > { %p1055_p11 = por %p1054_p10, %p1053_p9 }
 0x1db   : > { %p1051_p8 = pneg %p1050_p7 }
 0x1dc   : > { %p1057_p13 = por %p1056_p12, %p1055_p11 }
 0x1de   : > { %p1058_p0 = pnand %p1057_p13, %p1051_p8 }
 0x1e0   : > { %1061 = shalt.err (!%p1058_p0)
}
 0x1e1   : > { %s1099_s8 = smov 128   ;;  %s1100_s9 = smov 8  }
 0x1e2   : > { %977 = dma.vmem_to_hbm [thread:$0]  (%p1164_p5), %s1427_s11, 1024, %s1425_s14, %s1435_s19, %s1099_s8, %s1099_s8, %s1100_s9  }
 0x1e3 PF: > { %p983_p1 = scmp.ge.s32.totalorder %s1096_s18, 2  ;;  %s762_s10 = sand.u32 1, %s1084_s15  }
 0x1e4   : > { %s763_s12 = scalar_lea.sflag [#allocation3], %s762_s10 }
 0x1e5   : > { %p980_p2 = pnand %p983_p1, %p1168_p6 }
 0x1e7   : > { %1079 = dma.done.wait (!%p980_p2), %s763_s12, 1024  }
 0x1e8   : > { %1081 = vsyncadd (!%p980_p2), %s763_s12, 4294966272  ;;  %p14_p3 = scmp.ge.s32.totalorder %s1151_s21, 4   ;;  %s1483_s15 = smov %s1088_s16 }
 0x1e9   : > { %s1484_s16 = smov %s1092_s17  ;;  %s1485_s17 = smov %s1162_s24 }
 0x1ea   : > { %s1486_s18 = smov %s1151_s21  ;;  %16 = sbr.rel (!%p14_p3) target bundleno = 3 (0x3), region = 72 }
 0x1f1   :  { %768 = vsyncpa [#allocation3], 1 }
 0x1f2   :  { %770 = vsyncpa [#allocation3 + $0x1], 1 }

</bundles_post_ra>
